<compile_context>
chip_gen: v6e
topology: v6e:2x2x1
jax: 0.10.0
libtpu: 0.0.40
codegen_flags: <defaults>
</compile_context>

<pallas_src>
import functools
import math

import jax
import jax.numpy as jnp
from jax.experimental import pallas as pl
from jax.experimental.pallas import tpu as pltpu


def _round_up(x, m):
    return ((x + m - 1) // m) * m


def _activation_dtype_for_device():
    """bf16 SiLU on v6e / v7x (bf16 VPU/EUP); f32 on v5e and older (no bf16 path)."""
    try:
        kind = jax.devices()[0].device_kind.lower()
    except Exception:
        kind = ""
    if any(gen in kind for gen in ("v2", "v3", "v4", "v5")):
        return jnp.float32
    return jnp.bfloat16


def energy_guidance_kernel(
    t_ref, xc_ref, wf_ref, w1_ref, b1_ref, w2_ref, b2_ref, w3_ref, b3_ref,
    out_ref, *, act_dtype,
):
    cdtype = w1_ref.dtype  # MXU operand dtype (bf16 by default)

    # Gaussian Fourier time embedding (2*pi already folded into wf at init).
    # Feature-major: (Th, 1) * (1, TB) -> (Th, TB).  Projection + sin/cos in f32
    # (large-magnitude arguments), cast to the MXU dtype afterwards.
    proj = wf_ref[...] * t_ref[...]
    sin_e = jnp.sin(proj).astype(cdtype)
    cos_e = jnp.cos(proj).astype(cdtype)

    # Fused layer 1: concat([sin, cos, xc_padded]) along the feature (sublane)
    # axis -> a single MXU dot with K = 2*Th + Xpad (all 16-row bf16 chunks).
    h_in = jnp.concatenate([sin_e, cos_e, xc_ref[...]], axis=0)     # (K, TB)
    h1 = jnp.dot(w1_ref[...], h_in,
                 preferred_element_type=jnp.float32) + b1_ref[...]  # (H1, TB) f32
    h1 = h1.astype(act_dtype)
    h1 = h1 * jax.nn.sigmoid(h1)                                    # SiLU

    # Layer 2
    h2 = jnp.dot(w2_ref[...], h1.astype(cdtype),
                 preferred_element_type=jnp.float32) + b2_ref[...]  # (H2, TB) f32
    h2 = h2.astype(act_dtype)
    h2 = h2 * jax.nn.sigmoid(h2)                                    # SiLU

    # Output layer: (1, H2) x (H2, TB) -> (1, TB); lane-dense store.
    out_ref[...] = (jnp.dot(w3_ref[...], h2.astype(cdtype),
                            preferred_element_type=jnp.float32) + b3_ref[...])


def energy_guidance_forward(t, x, condition, params, tile_b=None):
    """Pallas forward: t (B,), x (B, X), condition (B, C) -> (B, 1) float32."""
    B = x.shape[0]
    x_dim = x.shape[-1]
    c_dim = condition.shape[-1]
    th = params["w_fourier"].shape[0]
    h1_dim = params["b1"].shape[0]
    h2_dim = params["b2"].shape[0]
    k_pad = params["w1"].shape[1]          # 2*th + xc_pad (already K-padded at init)
    xc_pad = k_pad - 2 * th
    compute_dtype = params["w1"].dtype
    act_dtype = _activation_dtype_for_device()

    if tile_b is None:
        # Large tiles amortize the ~0.35 us per-grid-step overhead; for
        # small/medium B split the batch into two tiles so v7x's two
        # TensorCores both get work ("parallel" grid axis).
        tile_b = max(128, min(2048, _round_up(pl.cdiv(B, 2), 128)))

    n_tiles = pl.cdiv(B, tile_b)
    b_pad = n_tiles * tile_b
    pad_b = b_pad - B

    # Single fused relayout (cheap under jit): cast to the MXU dtype FIRST so
    # the padded / transposed copy is bf16, then pad batch + feature and
    # transpose to feature-major (batch on the 128-lane axis).
    t2 = jnp.pad(t.reshape(1, B).astype(jnp.float32), ((0, 0), (0, pad_b)))
    xc = jnp.concatenate([x, condition], axis=-1).astype(compute_dtype)
    xc = jnp.pad(xc, ((0, pad_b), (0, xc_pad - (x_dim + c_dim)))).T   # (xc_pad, b_pad)

    row = lambda i: (0, i)     # batch-tiled arrays
    const = lambda i: (0, 0)   # weights/biases stay VMEM-resident across the grid

    flops = 2 * b_pad * (k_pad * h1_dim + h1_dim * h2_dim + h2_dim)
    transcendentals = b_pad * (2 * th + h1_dim + h2_dim)
    bytes_accessed = (
        t2.size * t2.dtype.itemsize
        + xc.size * xc.dtype.itemsize
        + b_pad * 4
        + sum(int(v.size) * v.dtype.itemsize for v in params.values())
    )

    kernel = functools.partial(energy_guidance_kernel, act_dtype=act_dtype)

    out = pl.pallas_call(
        kernel,
        out_shape=jax.ShapeDtypeStruct((1, b_pad), jnp.float32),
        grid_spec=pltpu.PrefetchScalarGridSpec(
            num_scalar_prefetch=0,
            grid=(n_tiles,),
            in_specs=[
                pl.BlockSpec((1, tile_b), row),                     # t
                pl.BlockSpec((xc_pad, tile_b), row),                # [x | cond | 0-pad]
                pl.BlockSpec(params["w_fourier"].shape, const),     # fourier W (f32)
                pl.BlockSpec(params["w1"].shape, const),            # W1^T (bf16, K-padded)
                pl.BlockSpec(params["b1"].shape, const),            # b1 (f32)
                pl.BlockSpec(params["w2"].shape, const),            # W2^T (bf16)
                pl.BlockSpec(params["b2"].shape, const),            # b2 (f32)
                pl.BlockSpec(params["w3"].shape, const),            # W3^T (bf16)
                pl.BlockSpec(params["b3"].shape, const),            # b3 (f32)
            ],
            out_specs=pl.BlockSpec((1, tile_b), row),
        ),
        compiler_params=pltpu.CompilerParams(
            dimension_semantics=("parallel",)),
        cost_estimate=pl.CostEstimate(
            flops=flops,
            transcendentals=transcendentals,
            bytes_accessed=bytes_accessed),
    )(t2, xc, params["w_fourier"], params["w1"], params["b1"],
      params["w2"], params["b2"], params["w3"], params["b3"])

    return out[0, :B].reshape(B, 1)


def init_params(key, x_dim, cond_dim, t_embed_dim, hidden1, hidden2,
                fourier_scale=30.0, compute_dtype=jnp.bfloat16):
    """Weights stored transposed ([out, in], like torch.nn.Linear.weight); matmul
    weights in bf16 (MXU operands), biases + Fourier weight in f32.  w1's input
    columns are zero-padded so the fused K (= 2*Th + round_up(X+C, 16)) packs
    cleanly into bf16 sublane groups."""
    th = t_embed_dim // 2              # prefer t_embed_dim a multiple of 32
    xc_dim = x_dim + cond_dim
    xc_pad = _round_up(xc_dim, 16)     # bf16 packs 16 rows per vreg
    in_dim = t_embed_dim + xc_dim
    k_pad = t_embed_dim + xc_pad
    ks = jax.random.split(key, 8)

    def dense_t(k, fan_in, fan_out):
        bound = 1.0 / math.sqrt(fan_in)
        return jax.random.uniform(k, (fan_out, fan_in), jnp.float32, -bound, bound)

    def bias(k, fan_in, fan_out):
        bound = 1.0 / math.sqrt(fan_in)
        return jax.random.uniform(k, (fan_out, 1), jnp.float32, -bound, bound)

    w1 = dense_t(ks[1], in_dim, hidden1)                      # (H1, 2Th+X+C)
    w1 = jnp.pad(w1, ((0, 0), (0, k_pad - in_dim)))           # zero input-cols -> K=k_pad

    params = dict(
        # 2*pi folded into the (non-trainable) Fourier weight
        w_fourier=(jax.random.normal(ks[0], (th, 1), jnp.float32)
                   * fourier_scale * 2.0 * math.pi),
        w1=w1.astype(compute_dtype),                          # (H1, k_pad)
        b1=bias(ks[2], in_dim, hidden1),
        w2=dense_t(ks[3], hidden1, hidden2).astype(compute_dtype),  # (H2, H1)
        b2=bias(ks[4], hidden1, hidden2),
        w3=dense_t(ks[5], hidden2, 1).astype(compute_dtype),        # (1, H2)
        b3=bias(ks[6], hidden2, 1),                                 # (1, 1)
    )
    return params


def energy_guidance_reference(t, x, condition, params):
    """Pure-JAX f32 reference (same bf16-stored weights, upcast to f32)."""
    B = x.shape[0]
    th = params["w_fourier"].shape[0]
    in_dim = 2 * th + x.shape[-1] + condition.shape[-1]
    wf = params["w_fourier"][:, 0]                                   # includes 2*pi
    proj = t.reshape(B, 1).astype(jnp.float32) * wf[None, :]
    emb = jnp.concatenate([jnp.sin(proj), jnp.cos(proj)], axis=-1)   # (B, 2Th)
    h = jnp.concatenate(
        [emb, x.astype(jnp.float32), condition.astype(jnp.float32)], axis=-1)
    w1 = params["w1"].astype(jnp.float32)[:, :in_dim]                # drop zero K-pad
    h1 = h @ w1.T + params["b1"][:, 0]
    h1 = h1 * jax.nn.sigmoid(h1)
    h2 = h1 @ params["w2"].astype(jnp.float32).T + params["b2"][:, 0]
    h2 = h2 * jax.nn.sigmoid(h2)
    return h2 @ params["w3"].astype(jnp.float32).T + params["b3"][0, 0]


# TODO(synk): calculate_energy_guidance needs grad of sum(forward) w.r.t. x; that
# requires a custom VJP for the Pallas kernel and is not implemented here.


if __name__ == "__main__":
    key = jax.random.PRNGKey(0)
    k_param, k_t, k_x, k_c = jax.random.split(key, 4)

    B, X_DIM, C_DIM = 8, 4, 8          # batch, action dim, condition (state) dim
    T_EMBED, H1, H2 = 32, 64, 64       # fourier embed dim, MLP hidden sizes

    params = init_params(k_param, X_DIM, C_DIM, T_EMBED, H1, H2)

    t = jax.random.uniform(k_t, (B,), jnp.float32)           # diffusion time in (0, 1)
    x = jax.random.normal(k_x, (B, X_DIM), jnp.float32)      # sample / action
    condition = jax.random.normal(k_c, (B, C_DIM), jnp.float32)

    fwd = jax.jit(energy_guidance_forward)   # fuses the wrapper relayout into one pass
    out = fwd(t, x, condition, params)
    jax.block_until_ready(out)

    ref = energy_guidance_reference(t, x, condition, params)

    assert out.shape == (B, 1) and out.dtype == jnp.float32
    assert bool(jnp.all(jnp.isfinite(out)))
    assert bool(jnp.allclose(out, ref, atol=5e-2, rtol=5e-2)), (
        f"max abs diff = {float(jnp.max(jnp.abs(out - ref)))}")
    print("KERNEL_OK")
</pallas_src>

<mosaic_0001>
module attributes {stable_mosaic.version = 11 : i64} {
  func.func @energy_guidance_kernel(%arg0: i32, %arg1: memref<1x128xf32, #tpu.memory_space<vmem>>, %arg2: memref<16x128xbf16, #tpu.memory_space<vmem>>, %arg3: memref<16x1xf32, #tpu.memory_space<vmem>>, %arg4: memref<64x48xbf16, #tpu.memory_space<vmem>>, %arg5: memref<64x1xf32, #tpu.memory_space<vmem>>, %arg6: memref<64x64xbf16, #tpu.memory_space<vmem>>, %arg7: memref<64x1xf32, #tpu.memory_space<vmem>>, %arg8: memref<1x64xbf16, #tpu.memory_space<vmem>>, %arg9: memref<1x1xf32, #tpu.memory_space<vmem>>, %arg10: memref<1x128xf32, #tpu.memory_space<vmem>>) attributes {dimension_semantics = [#tpu.dimension_semantics<parallel>], iteration_bounds = array<i64: 1>, scalar_prefetch = 0 : i64, scratch_operands = 0 : i64, tpu.core_type = #tpu.core_type<tc>, window_params = [{transform_indices = @transform_0, window_bounds = array<i64: 1, 128>}, {transform_indices = @transform_1, window_bounds = array<i64: 16, 128>}, {pipeline_mode = #tpu.pipeline_mode<synchronous>, transform_indices = @transform_2, window_bounds = array<i64: 16, 1>}, {pipeline_mode = #tpu.pipeline_mode<synchronous>, transform_indices = @transform_3, window_bounds = array<i64: 64, 48>}, {pipeline_mode = #tpu.pipeline_mode<synchronous>, transform_indices = @transform_4, window_bounds = array<i64: 64, 1>}, {pipeline_mode = #tpu.pipeline_mode<synchronous>, transform_indices = @transform_5, window_bounds = array<i64: 64, 64>}, {pipeline_mode = #tpu.pipeline_mode<synchronous>, transform_indices = @transform_6, window_bounds = array<i64: 64, 1>}, {pipeline_mode = #tpu.pipeline_mode<synchronous>, transform_indices = @transform_7, window_bounds = array<i64: 1, 64>}, {pipeline_mode = #tpu.pipeline_mode<synchronous>, transform_indices = @transform_8, window_bounds = array<i64: 1, 1>}, {transform_indices = @transform_9, window_bounds = array<i64: 1, 128>}]} {
    %c0 = arith.constant 0 : index
    %c0_0 = arith.constant 0 : index
    %0 = vector.load %arg3[%c0, %c0_0] : memref<16x1xf32, #tpu.memory_space<vmem>>, vector<16x1xf32>
    %c0_1 = arith.constant 0 : index
    %c0_2 = arith.constant 0 : index
    %1 = vector.load %arg1[%c0_1, %c0_2] : memref<1x128xf32, #tpu.memory_space<vmem>>, vector<1x128xf32>
    %2 = vector.broadcast %0 : vector<16x1xf32> to vector<16x128xf32>
    %3 = vector.broadcast %1 : vector<1x128xf32> to vector<16x128xf32>
    %4 = arith.mulf %2, %3 : vector<16x128xf32>
    %5 = math.sin %4 : vector<16x128xf32>
    %6 = arith.truncf %5 : vector<16x128xf32> to vector<16x128xbf16>
    %7 = math.cos %4 : vector<16x128xf32>
    %8 = arith.truncf %7 : vector<16x128xf32> to vector<16x128xbf16>
    %c0_3 = arith.constant 0 : index
    %c0_4 = arith.constant 0 : index
    %9 = vector.load %arg2[%c0_3, %c0_4] : memref<16x128xbf16, #tpu.memory_space<vmem>>, vector<16x128xbf16>
    %10 = tpu.concatenate %6, %8, %9 in 0 : vector<16x128xbf16>, vector<16x128xbf16>, vector<16x128xbf16> -> vector<48x128xbf16>
    %c0_5 = arith.constant 0 : index
    %c0_6 = arith.constant 0 : index
    %11 = vector.load %arg4[%c0_5, %c0_6] : memref<64x48xbf16, #tpu.memory_space<vmem>>, vector<64x48xbf16>
    %cst = arith.constant dense<0.000000e+00> : vector<64x128xf32>
    %12 = tpu.matmul %11, %10, %cst {dimension_numbers = #tpu.dot_dimension_numbers<[1], [0], [0], [1], [0, 0, 1, 1], [], []>} : vector<64x48xbf16>, vector<48x128xbf16>, vector<64x128xf32> -> vector<64x128xf32>
    %c0_7 = arith.constant 0 : index
    %c0_8 = arith.constant 0 : index
    %13 = vector.load %arg5[%c0_7, %c0_8] : memref<64x1xf32, #tpu.memory_space<vmem>>, vector<64x1xf32>
    %14 = vector.broadcast %13 : vector<64x1xf32> to vector<64x128xf32>
    %15 = arith.addf %12, %14 : vector<64x128xf32>
    %16 = arith.truncf %15 : vector<64x128xf32> to vector<64x128xbf16>
    %17 = arith.negf %16 : vector<64x128xbf16>
    %18 = math.exp %17 : vector<64x128xbf16>
    %cst_9 = arith.constant 1.000000e+00 : bf16
    %19 = vector.broadcast %cst_9 : bf16 to vector<64x128xbf16>
    %20 = arith.addf %19, %18 : vector<64x128xbf16>
    %21 = arith.divf %19, %20 : vector<64x128xbf16>
    %22 = arith.mulf %16, %21 : vector<64x128xbf16>
    %c0_10 = arith.constant 0 : index
    %c0_11 = arith.constant 0 : index
    %23 = vector.load %arg6[%c0_10, %c0_11] : memref<64x64xbf16, #tpu.memory_space<vmem>>, vector<64x64xbf16>
    %cst_12 = arith.constant dense<0.000000e+00> : vector<64x128xf32>
    %24 = tpu.matmul %23, %22, %cst_12 {dimension_numbers = #tpu.dot_dimension_numbers<[1], [0], [0], [1], [0, 0, 1, 1], [], []>} : vector<64x64xbf16>, vector<64x128xbf16>, vector<64x128xf32> -> vector<64x128xf32>
    %c0_13 = arith.constant 0 : index
    %c0_14 = arith.constant 0 : index
    %25 = vector.load %arg7[%c0_13, %c0_14] : memref<64x1xf32, #tpu.memory_space<vmem>>, vector<64x1xf32>
    %26 = vector.broadcast %25 : vector<64x1xf32> to vector<64x128xf32>
    %27 = arith.addf %24, %26 : vector<64x128xf32>
    %28 = arith.truncf %27 : vector<64x128xf32> to vector<64x128xbf16>
    %29 = arith.negf %28 : vector<64x128xbf16>
    %30 = math.exp %29 : vector<64x128xbf16>
    %cst_15 = arith.constant 1.000000e+00 : bf16
    %31 = vector.broadcast %cst_15 : bf16 to vector<64x128xbf16>
    %32 = arith.addf %31, %30 : vector<64x128xbf16>
    %33 = arith.divf %31, %32 : vector<64x128xbf16>
    %34 = arith.mulf %28, %33 : vector<64x128xbf16>
    %c0_16 = arith.constant 0 : index
    %c0_17 = arith.constant 0 : index
    %35 = vector.load %arg8[%c0_16, %c0_17] : memref<1x64xbf16, #tpu.memory_space<vmem>>, vector<1x64xbf16>
    %cst_18 = arith.constant dense<0.000000e+00> : vector<1x128xf32>
    %36 = tpu.matmul %35, %34, %cst_18 {dimension_numbers = #tpu.dot_dimension_numbers<[1], [0], [0], [1], [0, 0, 1, 1], [], []>} : vector<1x64xbf16>, vector<64x128xbf16>, vector<1x128xf32> -> vector<1x128xf32>
    %c0_19 = arith.constant 0 : index
    %c0_20 = arith.constant 0 : index
    %37 = vector.load %arg9[%c0_19, %c0_20] : memref<1x1xf32, #tpu.memory_space<vmem>>, vector<1x1xf32>
    %38 = vector.broadcast %37 : vector<1x1xf32> to vector<1x128xf32>
    %39 = arith.addf %36, %38 : vector<1x128xf32>
    %c0_21 = arith.constant 0 : index
    %c0_22 = arith.constant 0 : index
    %40 = vector.load %arg10[%c0_21, %c0_22] : memref<1x128xf32, #tpu.memory_space<vmem>>, vector<1x128xf32>
    tpu.vector_store %arg10[%c0_21, %c0_22], %39 {strides = array<i32>} : memref<1x128xf32, #tpu.memory_space<vmem>>, vector<1x128xf32>,
    return
  }
  func.func @transform_0(%arg0: i32) -> (i32, i32) {
    %c0_i32 = arith.constant 0 : i32
    %c0_i32_0 = arith.constant 0 : i32
    return %c0_i32, %arg0 : i32, i32
  }
  func.func @transform_1(%arg0: i32) -> (i32, i32) {
    %c0_i32 = arith.constant 0 : i32
    %c0_i32_0 = arith.constant 0 : i32
    return %c0_i32, %arg0 : i32, i32
  }
  func.func @transform_2(%arg0: i32) -> (i32, i32) {
    %c0_i32 = arith.constant 0 : i32
    %c0_i32_0 = arith.constant 0 : i32
    %c0_i32_1 = arith.constant 0 : i32
    return %c0_i32, %c0_i32_0 : i32, i32
  }
  func.func @transform_3(%arg0: i32) -> (i32, i32) {
    %c0_i32 = arith.constant 0 : i32
    %c0_i32_0 = arith.constant 0 : i32
    %c0_i32_1 = arith.constant 0 : i32
    return %c0_i32, %c0_i32_0 : i32, i32
  }
  func.func @transform_4(%arg0: i32) -> (i32, i32) {
    %c0_i32 = arith.constant 0 : i32
    %c0_i32_0 = arith.constant 0 : i32
    %c0_i32_1 = arith.constant 0 : i32
    return %c0_i32, %c0_i32_0 : i32, i32
  }
  func.func @transform_5(%arg0: i32) -> (i32, i32) {
    %c0_i32 = arith.constant 0 : i32
    %c0_i32_0 = arith.constant 0 : i32
    %c0_i32_1 = arith.constant 0 : i32
    return %c0_i32, %c0_i32_0 : i32, i32
  }
  func.func @transform_6(%arg0: i32) -> (i32, i32) {
    %c0_i32 = arith.constant 0 : i32
    %c0_i32_0 = arith.constant 0 : i32
    %c0_i32_1 = arith.constant 0 : i32
    return %c0_i32, %c0_i32_0 : i32, i32
  }
  func.func @transform_7(%arg0: i32) -> (i32, i32) {
    %c0_i32 = arith.constant 0 : i32
    %c0_i32_0 = arith.constant 0 : i32
    %c0_i32_1 = arith.constant 0 : i32
    return %c0_i32, %c0_i32_0 : i32, i32
  }
  func.func @transform_8(%arg0: i32) -> (i32, i32) {
    %c0_i32 = arith.constant 0 : i32
    %c0_i32_0 = arith.constant 0 : i32
    %c0_i32_1 = arith.constant 0 : i32
    return %c0_i32, %c0_i32_0 : i32, i32
  }
  func.func @transform_9(%arg0: i32) -> (i32, i32) {
    %c0_i32 = arith.constant 0 : i32
    %c0_i32_0 = arith.constant 0 : i32
    return %c0_i32, %arg0 : i32, i32
  }
}

</mosaic_0001>

<bundles_post_ra>
// kernel: energy_guidance_forward.1
= control target key start
LH: loop header
LB: loop body
LE: loop exit
PB: predicated region body
PF: predicated region fallthrough
CT: control target
= control target key end

     0   :  { %v1093_v0 = vmov 0   ;;  %vm557_vm0 = vcmask 392192   ;;  %v1094_v42 = vmov 683565275   ;;  %v1095_v47 = vmov 2475754826   ;;  %s1342_s2 = inlined_call_operand.vmem [shape: f32[16,1], index: 2, kind: input, shape index: {}]   ;;  %s1343_s8 = inlined_call_operand.<no memory space> [shape: f32[1,1], index: 8, kind: input, shape index: {}]   ;;  %s1344_s4 = inlined_call_operand.vmem [shape: f32[64,1], index: 4, kind: input, shape index: {}]   ;;  %s1345_s6 = inlined_call_operand.vmem [shape: f32[64,1], index: 6, kind: input, shape index: {}]   ;;  %s1346_s1 = inlined_call_operand.vmem [shape: bf16[16,128], index: 1, kind: input, shape index: {}]   ;;  %s1347_s3 = inlined_call_operand.vmem [shape: bf16[64,48], index: 3, kind: input, shape index: {}]   ;;  %s1348_s0 = inlined_call_operand.vmem [shape: f32[1,128], index: 0, kind: input, shape index: {}]   ;;  %s1349_s5 = inlined_call_operand.vmem [shape: bf16[64,64], index: 5, kind: input, shape index: {}]   ;;  %s1350_s7 = inlined_call_operand.vmem [shape: bf16[1,64], index: 7, kind: input, shape index: {}]   ;;  %s1351_s9 = inlined_call_operand.vmem [shape: f32[1,128], index: 9, kind: output, shape index: {}]  }
   0x1   :  { %1042 = vset.pattern.permute.xlu0 %v1093_v0  ;;  %v36_v1 = vld [vmem:[%s1342_s2] sm:$0xff]  ;;  %v14_v2 = vstv %s1343_s8  ;;  %1043 = vset.pattern.permute.xlu1 %v1093_v0  ;;  %v37_v3 = vld [vmem:[%s1342_s2 + $0x8] sm:$0xff]  ;;  %v491_v5 = vld [vmem:[%s1344_s4 + $0x10] sm:$0xff]  ;;  %v1096_v49 = vmov 2131351028  }
   0x2   :  { %41 = vperm.xlu0 %1042, %v36_v1   ;;  %15 = vst [vmem:[#allocation2] sm:$0x1] %v14_v2  ;;  %v493_v4 = vld [vmem:[%s1344_s4 + $0x20] sm:$0xff]  ;;  %v685_v7 = vld [vmem:[%s1345_s6 + $0x30] sm:$0xff]  ;;  %v496_v15 = vld [vmem:[%s1344_s4 + $0x38] sm:$0xff] }
   0x3   :  { %v489_v6 = vld [vmem:[%s1344_s4] sm:$0xff]  ;;  %v681_v9 = vld [vmem:[%s1345_s6 + $0x10] sm:$0xff]  ;;  %v494_v16 = vld [vmem:[%s1344_s4 + $0x28] sm:$0xff]  ;;  %v1097_v51 = vmov 2102212464  }
   0x4   :  { %v683_v8 = vld [vmem:[%s1345_s6 + $0x20] sm:$0xff]  ;;  %v495_v14 = vld [vmem:[%s1344_s4 + $0x30] sm:$0xff]  ;;  %v492_v18 = vld [vmem:[%s1344_s4 + $0x18] sm:$0xff]  ;;  %v1098_v53 = vmov 920167782  }
   0x5   :  { %v679_v10 = vld [vmem:[%s1345_s6] sm:$0xff]  ;;  %529 = vperm.xlu1 %1043, %v495_v14   ;;  %v490_v23 = vld [vmem:[%s1344_s4 + $0x8] sm:$0xff]  ;;  %v686_v29 = vld [vmem:[%s1345_s6 + $0x38] sm:$0xff]  ;;  %v1099_v60 = vmov 1326507024  }
   0x6   :  { %46 = vperm.xlu0 %1042, %v37_v3   ;;  %v1044_v12 = vld [vmem:[%s1346_s1] sm:$0xff]   ;;  %v684_v35 = vld [vmem:[%s1345_s6 + $0x28] sm:$0xff]  ;;  %v682_v46 = vld [vmem:[%s1345_s6 + $0x18] sm:$0xff] }
   0x7   :  { %983 = vmatprep.subr.bf16.mxu0 %v1044_v12  ;;  %v1045_v13 = vld [vmem:[%s1347_s3] sm:$0xff]   ;;  %v680_v1 = vld [vmem:[%s1345_s6 + $0x8] sm:$0xff] }
   0x8   :  { %984 = vmatpush3.bf16.msra.mxu0 %v1044_v12  ;;  %989 = vmatprep.mubr.msk.bf16.mxu0 %vm557_vm0, %v1045_v13  ;;  %v920_v17 = vld [vmem:[%s1348_s0] ss:$0 sm:$0xff] }
   0x9   :  { %v862_v11 = vld [vmem:[#allocation2] sm:$0x1]  ;;  %534 = vperm.xlu1 %1043, %v496_v15  }
   0xa   :  { %519 = vperm.xlu0 %1042, %v493_v4  }
   0xd   :  { %524 = vperm.xlu1 %1043, %v494_v16  }
   0xe   :  { %509 = vperm.xlu0 %1042, %v491_v5  }
  0x11   :  { %514 = vperm.xlu1 %1043, %v492_v18  }
  0x12   :  { %499 = vperm.xlu0 %1042, %v489_v6  }
  0x15   :  { %504 = vperm.xlu1 %1043, %v490_v23  }
  0x16   :  { %719 = vperm.xlu0 %1042, %v685_v7  }
  0x19   :  { %724 = vperm.xlu1 %1043, %v686_v29  }
  0x1a   :  { %709 = vperm.xlu0 %1042, %v683_v8  }
  0x1d   :  { %714 = vperm.xlu1 %1043, %v684_v35  }
  0x1e   :  { %699 = vperm.xlu0 %1042, %v681_v9  }
  0x21   :  { %704 = vperm.xlu1 %1043, %v682_v46  }
  0x22   :  { %689 = vperm.xlu0 %1042, %v679_v10  }
  0x25   :  { %694 = vperm.xlu1 %1043, %v680_v1  }
  0x26   :  { %865 = vperm.xlu0 %1042, %v862_v11  }
  0x7d   :  { %v42_v19 = vpop.permute.xlu0 %41 }
  0x7e   :  { %v1204_v20 = vmul.f32 %v920_v17, %v42_v19 }
  0x80   :  { %v57_v21 = vand.u32 2147483647, %v1204_v20  ;;  %v60_v22 = vand.u32 2139095040, %v1204_v20  ;;  %vm59_vm15 = vcmp.lt.s32.totalorder %v1204_v20, 0 }
  0x81   :  { %v47_v24 = vpop.permute.xlu0 %46 }
  0x82   :  { %v61_v25 = vshrl.u32 %v60_v22, 23  ;;  %v1211_v26 = vmul.f32 %v920_v17, %v47_v24  ;;  %v64_v27 = vand.u32 8388607, %v57_v21 }
  0x84   :  { %v921_v28 = vadd.s32 4294967169, %v61_v25  ;;  %v164_v30 = vand.u32 2139095040, %v1211_v26  ;;  %v65_v32 = vor.u32 8388608, %v64_v27  ;;  %v161_v34 = vand.u32 2147483647, %v1211_v26 }
  0x86   :  { %v67_v31 = vadd.s32 1, %v921_v28  ;;  %v165_v33 = vshrl.u32 %v164_v30, 23  ;;  %v1223_v40 = vshll.u32 %v65_v32, 8  ;;  %v168_v44 = vand.u32 8388607, %v161_v34 }
  0x88   :  { %vm68_vm1 = vcmp.gt.s32.totalorder %v67_v31, 0  ;;  %v925_v37 = vadd.s32 4294967169, %v165_v33  ;;  %v169_v12 = vor.u32 8388608, %v168_v44 }
  0x89   :  { %v69_v36 = vsel %vm68_vm1, %v67_v31, 0  ;;  %vm1277_vm1 = vcmp.le.f32.partialorder %v57_v21, 0.7853982 }
  0x8a   :  { %v70_v38 = vshrl.u32 %v69_v36, 5  ;;  %v71_v39 = vand.u32 31, %v69_v36  ;;  %v171_v45 = vadd.s32 1, %v925_v37  ;;  %v209_v28 = vshll.u32 %v169_v12, 8 }
  0x8c   :  { %v72_v41 = vsub.s32 32, %v71_v39  ;;  %v74_v43 = vshll.u32 %v1094_v42, %v71_v39  ;;  %v77_v48 = vshll.u32 %v1095_v47, %v71_v39  ;;  %v80_v50 = vshll.u32 %v1096_v49, %v71_v39 }
  0x8d   :  { %v83_v52 = vshll.u32 %v1097_v51, %v71_v39  ;;  %v86_v54 = vshll.u32 %v1098_v53, %v71_v39  ;;  %vm89_vm2 = vcmp.lt.s32.totalorder %v70_v38, 1  ;;  %vm91_vm3 = vcmp.lt.s32.totalorder %v70_v38, 3 }
  0x8e   :  { %v75_v55 = vshrl.u32 %v1095_v47, %v72_v41  ;;  %v78_v56 = vshrl.u32 %v1096_v49, %v72_v41  ;;  %v81_v57 = vshrl.u32 %v1097_v51, %v72_v41  ;;  %v73_v58 = vshrl.u32 %v1094_v42, %v72_v41 }
  0x8f   :  { %v84_v59 = vshrl.u32 %v1098_v53, %v72_v41  ;;  %v87_v61 = vshrl.u32 %v1099_v60, %v72_v41  ;;  %vm172_vm4 = vcmp.gt.s32.totalorder %v171_v45, 0  ;;  %vm92_vm5 = vcmp.lt.s32.totalorder %v70_v38, 4 }
  0x90   :  { %v76_v62 = vor.u32 %v75_v55, %v74_v43  ;;  %v79_v63 = vor.u32 %v78_v56, %v77_v48  ;;  %v82_v0 = vor.u32 %v81_v57, %v80_v50  ;;  %v173_v4 = vsel %vm172_vm4, %v171_v45, 0 }
  0x91   :  { %v85_v2 = vor.u32 %v84_v59, %v83_v52  ;;  %v88_v3 = vor.u32 %v87_v61, %v86_v54  ;;  %vm90_vm6 = vcmp.lt.s32.totalorder %v70_v38, 2  ;;  %v175_v15 = vand.u32 31, %v173_v4 }
  0x92   :  { %v93_v5 = vsel %vm89_vm2, %v73_v58, %v76_v62  ;;  %v94_v6 = vsel %vm92_vm5, %v82_v0, 2102212464  ;;  %v97_v7 = vsel %vm89_vm2, %v76_v62, %v79_v63  ;;  %v101_v8 = vsel %vm89_vm2, %v79_v63, %v82_v0 }
  0x93   :  { %v95_v9 = vsel %vm91_vm3, %v79_v63, %v94_v6  ;;  %v98_v10 = vsel %vm92_vm5, %v85_v2, 920167782  ;;  %v102_v11 = vsel %vm92_vm5, %v88_v3, 1326507024  ;;  %v174_v25 = vshrl.u32 %v173_v4, 5 }
  0x94   :  { %v99_v13 = vsel %vm91_vm3, %v82_v0, %v98_v10  ;;  %v103_v14 = vsel %vm91_vm3, %v85_v2, %v102_v11  ;;  %v96_v16 = vsel %vm90_vm6, %v93_v5, %v95_v9  ;;  %v176_v27 = vsub.s32 32, %v175_v15 }
  0x95   :  { %v100_v17 = vsel %vm90_vm6, %v97_v7, %v99_v13  ;;  %v104_v18 = vsel %vm90_vm6, %v101_v8, %v103_v14  ;;  %v112_v29 = vmul.u32 %v1223_v40, %v96_v16  ;;  %v178_v30 = vshll.u32 %v1094_v42, %v175_v15 }
  0x96   :  { %v1242_v19 = vmul.u32.u64.low %v1223_v40, %v104_v18  ;;  %v1243_v22 = vmul.u32.u64.high %v1223_v40, %v104_v18, %v1242_v19  ;;  %v1246_v23 = vmul.u32.u64.low %v1223_v40, %v100_v17  ;;  %v1247_v24 = vmul.u32.u64.high %v1223_v40, %v100_v17, %v1246_v23 }
  0x97   :  { %v181_v31 = vshll.u32 %v1095_v47, %v175_v15  ;;  %v184_v32 = vshll.u32 %v1096_v49, %v175_v15  ;;  %v179_v33 = vshrl.u32 %v1095_v47, %v176_v27  ;;  %v182_v35 = vshrl.u32 %v1096_v49, %v176_v27 }
  0x98   :  { %v185_v36 = vshrl.u32 %v1097_v51, %v176_v27  ;;  %v187_v37 = vshll.u32 %v1097_v51, %v175_v15  ;;  %vm114_vm7 = vc.u32 %v1243_v22, %v1246_v23  ;;  %v115_v38 = vadd.s32 1, %v1247_v24 }
  0x99   :  { %v188_v39 = vshrl.u32 %v1098_v53, %v176_v27  ;;  %v190_v41 = vshll.u32 %v1098_v53, %v175_v15  ;;  %v180_v43 = vor.u32 %v179_v33, %v178_v30  ;;  %v183_v44 = vor.u32 %v182_v35, %v181_v31 }
  0x9a   :  { %v186_v45 = vor.u32 %v185_v36, %v184_v32  ;;  %v191_v46 = vshrl.u32 %v1099_v60, %v176_v27  ;;  %v116_v40 = vsel %vm114_vm7, %v115_v38, %v1247_v24  ;;  %vm193_vm8 = vcmp.lt.s32.totalorder %v174_v25, 1 }
  0x9b   :  { %v189_v48 = vor.u32 %v188_v39, %v187_v37  ;;  %vm196_vm9 = vcmp.lt.s32.totalorder %v174_v25, 4  ;;  %v117_v47 = vadd.s32 %v116_v40, %v112_v29  ;;  %vm195_vm10 = vcmp.lt.s32.totalorder %v174_v25, 3 }
  0x9c   :  { %v192_v49 = vor.u32 %v191_v46, %v190_v41  ;;  %v198_v50 = vsel %vm196_vm9, %v186_v45, 2102212464  ;;  %v177_v51 = vshrl.u32 %v1094_v42, %v176_v27  ;;  %v201_v52 = vsel %vm193_vm8, %v180_v43, %v183_v44 }
  0x9d   :  { %v202_v54 = vsel %vm196_vm9, %v189_v48, 920167782  ;;  %v205_v55 = vsel %vm193_vm8, %v183_v44, %v186_v45  ;;  %v118_v56 = vadd.s32 536870912, %v117_v47  ;;  %vm194_vm11 = vcmp.lt.s32.totalorder %v174_v25, 2 }
  0x9e   :  { %v203_v53 = vsel %vm195_vm10, %v186_v45, %v202_v54  ;;  %v206_v57 = vsel %vm196_vm9, %v192_v49, 1326507024  ;;  %v197_v58 = vsel %vm193_vm8, %v177_v51, %v180_v43  ;;  %v199_v59 = vsel %vm195_vm10, %v183_v44, %v198_v50 }
  0x9f   :  { %v204_v60 = vsel %vm194_vm11, %v201_v52, %v203_v53  ;;  %v207_v61 = vsel %vm195_vm10, %v189_v48, %v206_v57  ;;  %v1257_v62 = vshrl.u32 %v118_v56, 30  ;;  %v200_v4 = vsel %vm194_vm11, %v197_v58, %v199_v59 }
  0xa0   :  { %v208_v63 = vsel %vm194_vm11, %v205_v55, %v207_v61  ;;  %v1259_v0 = vmul.u32.u64.low %v209_v28, %v204_v60  ;;  %v1260_v1 = vmul.u32.u64.high %v209_v28, %v204_v60, %v1259_v0  ;;  %v216_v7 = vmul.u32 %v209_v28, %v200_v4 }
  0xa1   :  { %v1262_v2 = vmul.u32.u64.low %v209_v28, %v208_v63  ;;  %v1263_v3 = vmul.u32.u64.high %v209_v28, %v208_v63, %v1262_v2  ;;  %v120_v42 = vshll.u32 %v1257_v62, 30  ;;  %v113_v19 = vadd.s32 %v1246_v23, %v1243_v22 }
  0xa2   :  { %v219_v6 = vadd.s32 1, %v1260_v1  ;;  %v143_v57 = vsub.s32 4, %v1257_v62  ;;  %vm163_vm2 = vcmp.lt.s32.totalorder %v1211_v26, 0  ;;  %vm162_vm3 = vcmp.le.f32.partialorder %v161_v34, 0.7853982 }
  0xa3   :  { %v121_v5 = vsub.s32 %v117_v47, %v120_v42  ;;  %vm218_vm12 = vc.u32 %v1263_v3, %v1259_v0  ;;  %v217_v44 = vadd.s32 %v1259_v0, %v1263_v3  ;;  %vm149_vm4 = vweird.f32 %v1204_v20 }
  0xa4   :  { %v220_v9 = vsel %vm218_vm12, %v219_v6, %v1260_v1  ;;  %v144_v61 = vsel %vm59_vm15, %v143_v57, %v1257_v62 }
  0xa5   :  { %v123_v8 = vsub.s32 0, %v121_v5  ;;  %v221_v10 = vadd.s32 %v220_v9, %v216_v7  ;;  %v146_v0 = vsel %vm1277_vm1, 0, %v144_v61 }
  0xa6   :  { %v150_v3 = vadd.s32 3, %v146_v0 }
  0xa7   :  { %v922_v11 = vmin.u32 %v123_v8, %v121_v5  ;;  %v222_v12 = vadd.s32 536870912, %v221_v10 }
  0xa8   :  { %v151_v7 = vand.u32 3, %v150_v3 }
  0xa9   :  { %v125_v13 = vclz %v922_v11  ;;  %v223_v14 = vshrl.u32 %v222_v12, 30 }
  0xaa   :  { %vm152_vm8 = vcmp.lt.s32.totalorder %v151_v7, 2  ;;  %vm153_vm9 = vcmp.eq.s32.totalorder %v151_v7, 0  ;;  %vm156_vm12 = vcmp.eq.s32.totalorder %v151_v7, 2 }
  0xab   :  { %v923_v15 = vadd.s32 4294967294, %v125_v13  ;;  %v224_v16 = vshll.u32 %v223_v14, 30  ;;  %v247_v21 = vsub.s32 4, %v223_v14 }
  0xad   :  { %vm924_vm13 = vcmp.lt.s32.totalorder %v923_v15, 0  ;;  %v225_v18 = vsub.s32 %v221_v10, %v224_v16  ;;  %v248_v63 = vsel %vm163_vm2, %v247_v21, %v223_v14 }
  0xae   :  { %v128_v17 = vsel %vm924_vm13, 0, %v923_v15  ;;  %v250_v1 = vsel %vm162_vm3, 0, %v248_v63 }
  0xaf   :  { %v129_v24 = vsub.s32 32, %v128_v17  ;;  %v133_v25 = vsub.s32 4294967266, %v128_v17  ;;  %v227_v27 = vsub.s32 0, %v225_v18  ;;  %v130_v28 = vshll.u32 %v121_v5, %v128_v17 }
  0xb0   :  { %v254_v4 = vadd.s32 3, %v250_v1  ;;  %v359_v5 = vand.u32 3, %v146_v0  ;;  %v462_v8 = vand.u32 3, %v250_v1 }
  0xb1   :  { %v131_v29 = vshrl.u32 %v113_v19, %v129_v24  ;;  %v134_v30 = vadd.s32 127, %v133_v25  ;;  %v926_v31 = vmin.u32 %v227_v27, %v225_v18 }
  0xb2   :  { %v255_v9 = vand.u32 3, %v254_v4  ;;  %vm360_vm5 = vcmp.lt.s32.totalorder %v359_v5, 2  ;;  %vm361_vm6 = vcmp.eq.s32.totalorder %v359_v5, 0  ;;  %vm364_vm7 = vcmp.eq.s32.totalorder %v359_v5, 2 }
  0xb3   :  { %v132_v32 = vor.u32 %v131_v29, %v130_v28  ;;  %v135_v33 = vshll.u32 %v134_v30, 23  ;;  %v229_v35 = vclz %v926_v31  ;;  %vm464_vm10 = vcmp.eq.s32.totalorder %v462_v8, 0 }
  0xb4   :  { %vm467_vm11 = vcmp.eq.s32.totalorder %v462_v8, 2  ;;  %vm260_vm13 = vcmp.eq.s32.totalorder %v255_v9, 2 }
  0xb5   :  { %v136_v36 = vor.u32 4788187, %v135_v33  ;;  %v927_v37 = vadd.s32 4294967294, %v229_v35  ;;  %v139_v39 = vcvt.s32.f32 %v132_v32 }
  0xb7   :  { %v137_v38 = vand.u32 2147483647, %v136_v36  ;;  %vm928_vm14 = vcmp.lt.s32.totalorder %v927_v37, 0 }
  0xb8   :  { %v232_v43 = vsel %vm928_vm14, 0, %v927_v37  ;;  %vm257_vm14 = vcmp.eq.s32.totalorder %v255_v9, 0  ;;  %v1047_v37 = vld [vmem:[%s1347_s3 + $0x10] sm:$0xff]  }
  0xb9   :  { %v140_v41 = vmul.f32 %v139_v39, %v137_v38  ;;  %v233_v22 = vsub.s32 32, %v232_v43  ;;  %v237_v23 = vsub.s32 4294967266, %v232_v43  ;;  %v234_v46 = vshll.u32 %v225_v18, %v232_v43  ;;  %v1049_v38 = vld [vmem:[%s1349_s5] sm:$0xff]   ;;  %v530_v39 = vpop.permute.xlu1 %529 }
  0xbb   :  { %v141_v45 = vxor.u32 2147483648, %v140_v41  ;;  %v235_v40 = vshrl.u32 %v217_v44, %v233_v22  ;;  %v238_v48 = vadd.s32 127, %v237_v23  ;;  %v520_v44 = vpop.permute.xlu0 %519 }
  0xbd   :  { %v142_v47 = vsel %vm59_vm15, %v141_v45, %v140_v41  ;;  %v236_v50 = vor.u32 %v235_v40, %v234_v46  ;;  %v239_v51 = vshll.u32 %v238_v48, 23  ;;  %vm463_vm15 = vcmp.lt.s32.totalorder %v462_v8, 2  ;;  %v535_v41 = vpop.permute.xlu1 %534 }
  0xbe   :  { %v145_v52 = vsel %vm1277_vm1, %v1204_v20, %v142_v47  ;;  %vm256_vm1 = vcmp.lt.s32.totalorder %v255_v9, 2  ;;  %v1048_v20 = vld [vmem:[%s1347_s3 + $0x18] sm:$0xff]  }
  0xbf   :  { %v240_v54 = vor.u32 4788187, %v239_v51  ;;  %1053 = vcosq.f32 %v145_v52  ;;  %v243_v56 = vcvt.s32.f32 %v236_v50  ;;  %v510_v46 = vpop.permute.xlu0 %509 }
  0xc0   :  { %1055 = vsinq.f32 %v145_v52 }
  0xc1   :  { %v241_v55 = vand.u32 2147483647, %v240_v54  ;;  %v525_v43 = vpop.permute.xlu1 %524 }
  0xc3   :  { %v244_v53 = vmul.f32 %v243_v56, %v241_v55  ;;  %v500_v55 = vpop.permute.xlu0 %499 }
  0xc5   :  { %v245_v58 = vxor.u32 2147483648, %v244_v53  ;;  %v515_v23 = vpop.permute.xlu1 %514 }
  0xc7   :  { %v246_v59 = vsel %vm163_vm2, %v245_v58, %v244_v53  ;;  %vm253_vm2 = vweird.f32 %v1211_v26 }
  0xc8   :  { %v249_v60 = vsel %vm162_vm3, %v1211_v26, %v246_v59  ;;  %v1046_v26 = vld [vmem:[%s1347_s3 + $0x8] sm:$0xff]   ;;  %vm747_vm3 = vcmask 523264  }
  0xc9   :  { %1057 = vcosq.f32 %v249_v60  ;;  %1005 = vmatprep.mubr.msk.bf16.mxu1 %vm747_vm3, %v1049_v38  ;;  %v505_v50 = vpop.permute.xlu1 %504 }
  0xca   :  { %1059 = vsinq.f32 %v249_v60 }
  0xcc   :  { %v1054_v2 = vpop.eup %1053 }
  0xcd   :  { %v1056_v42 = vpop.eup %1055  ;;  %v157_v6 = vxor.u32 2147483648, %v1054_v2 }
  0xce   :  { %v154_v34 = vxor.u32 2147483648, %v1056_v42 }
  0xcf   :  { %v366_v11 = vsel %vm364_vm7, %v157_v6, %v1056_v42  ;;  %v158_v16 = vsel %vm156_vm12, %v157_v6, %v1056_v42 }
  0xd0   :  { %v363_v10 = vsel %vm361_vm6, %v1054_v2, %v154_v34  ;;  %v155_v15 = vsel %vm153_vm9, %v1054_v2, %v154_v34 }
  0xd1   :  { %v367_v17 = vsel %vm360_vm5, %v363_v10, %v366_v11  ;;  %v159_v28 = vsel %vm152_vm8, %v155_v15, %v158_v16 }
  0xd2   :  { %v368_v30 = vsel %vm149_vm4, nan, %v367_v17  ;;  %v160_v35 = vsel %vm149_vm4, nan, %v159_v28  ;;  %v1050_v28 = vld [vmem:[%s1349_s5 + $0x8] sm:$0xff]  }
  0xd6   :  { %v1058_v62 = vpop.eup %1057 }
  0xd7   :  { %v1060_v12 = vpop.eup %1059  ;;  %v261_v13 = vxor.u32 2147483648, %v1058_v62 }
  0xd8   :  { %v258_v14 = vxor.u32 2147483648, %v1060_v12 }
  0xd9   :  { %v469_v18 = vsel %vm467_vm11, %v261_v13, %v1060_v12  ;;  %v262_v19 = vsel %vm260_vm13, %v261_v13, %v1060_v12 }
  0xda   :  { %v466_v24 = vsel %vm464_vm10, %v1058_v62, %v258_v14  ;;  %v259_v25 = vsel %vm257_vm14, %v1058_v62, %v258_v14 }
  0xdb   :  { %v470_v27 = vsel %vm463_vm15, %v466_v24, %v469_v18  ;;  %v263_v29 = vsel %vm256_vm1, %v259_v25, %v262_v19 }
  0xdc   :  { %v471_v31 = vsel %vm253_vm2, nan, %v470_v27  ;;  %v264_v32 = vsel %vm253_vm2, nan, %v263_v29  ;;  %v1051_v29 = vld [vmem:[%s1349_s5 + $0x10] sm:$0xff]  }
  0xdd   :  { %v472_v33 = vpack.c.bf16 %v471_v31, %v368_v30  ;;  %v265_v36 = vpack.c.bf16 %v264_v32, %v160_v35  ;;  %v1052_v30 = vld [vmem:[%s1349_s5 + $0x18] sm:$0xff]   ;;  %v1100_v31 = vmov 0.0   ;;  %v725_v32 = vpop.permute.xlu1 %724 }
  0xdf   :  { %985 = vmatprep.subr.bf16.mxu0 %v472_v33 }
  0xe0   :  { %986 = vmatpush3.bf16.msra.mxu0 %v472_v33  ;;  %v720_v33 = vpop.permute.xlu0 %719 }
  0xe1   :  { %987 = vmatprep.subr.bf16.mxu0 %v265_v36  ;;  %v715_v35 = vpop.permute.xlu1 %714 }
  0xe4   :  { %988 = vmatpush3.bf16.msra.mxu0 %v265_v36  ;;  %v710_v36 = vpop.permute.xlu0 %709 }
  0xe5   :  { %1013 = vmatprep.subr.bf16.mxu0 %v1100_v31 }
  0xe7   :  { %990 = vmatmul.mubr.msk.bf16.vlgmr.msra.gmra.mxu0 %vm557_vm0, %v1046_v26 }
  0xe8   :  { %993 = vmatprep.mubr.msk.bf16.mxu0 %vm557_vm0, %v1047_v37 }
  0xef   :  { %994 = vmatmul.mubr.msk.bf16.gmra.mxu0 %vm557_vm0, %v1048_v20  ;;  %vm1101_vm0 = vmmov 0   ;;  %v705_v20 = vpop.permute.xlu1 %704 }
  0xf0   :  { %1021 = vmatprep.mubr.msk.bf16.mxu0 %vm1101_vm0, %v1100_v31 }
 0x1a7   :  { %v991_v22 = vpop.f32.mrf.mxu0 }
 0x1a8   :  { %v613_v47 = vadd.f32 %v991_v22, %v510_v46 }
 0x1a9   :  { %v604_v45 = vpop.f32.mrf.mxu0 }
 0x1aa   :  { %v605_v56 = vadd.f32 %v604_v45, %v500_v55 }
 0x1ab   :  { %v992_v40 = vpop.f32.mrf.mxu0 }
 0x1ac   :  { %v616_v48 = vadd.f32 %v992_v40, %v515_v23  ;;  %v695_v23 = vpop.permute.xlu1 %694 }
 0x1ad   :  { %v607_v49 = vpop.f32.mrf.mxu0 }
 0x1ae   :  { %v636_v51 = vpack.c.bf16 %v616_v48, %v613_v47  ;;  %v608_v52 = vadd.f32 %v607_v49, %v505_v50 }
 0x1af   :  { %v995_v54 = vpop.f32.mrf.mxu0 }
 0x1b0   :  { %v947_v57 = vmul.bf16 3216621497, %v636_v51  ;;  %v635_v58 = vpack.c.bf16 %v608_v52, %v605_v56  ;;  %v629_v59 = vadd.f32 %v995_v54, %v530_v39  ;;  %v700_v39 = vpop.permute.xlu0 %699 }
 0x1b1   :  { %v620_v53 = vpop.f32.mrf.mxu0 }
 0x1b2   :  { %v621_v63 = vadd.f32 %v620_v53, %v520_v44  ;;  %1061 = vpow.bf16 %v947_v57  ;;  %v946_v2 = vmul.bf16 3216621497, %v635_v58 }
 0x1b3   :  { %v996_v21 = vpop.f32.mrf.mxu0 }
 0x1b4   :  { %v632_v60 = vadd.f32 %v996_v21, %v535_v41  ;;  %v690_v48 = vpop.permute.xlu0 %689 }
 0x1b5   :  { %v623_v61 = vpop.f32.mrf.mxu0 }
 0x1b6   :  { %v638_v0 = vpack.c.bf16 %v632_v60, %v629_v59  ;;  %v624_v1 = vadd.f32 %v623_v61, %v525_v43 }
 0x1b8   :  { %v949_v3 = vmul.bf16 3216621497, %v638_v0  ;;  %v637_v42 = vpack.c.bf16 %v624_v1, %v621_v63 }
 0x1ba   :  { %1063 = vpow.bf16 %v949_v3  ;;  %v948_v4 = vmul.bf16 3216621497, %v637_v42 }
 0x1bb   :  { %1065 = vpow.bf16 %v946_v2 }
 0x1bc   :  { %1067 = vpow.bf16 %v948_v4 }
 0x1c0   :  { %v1062_v5 = vpop.eup %1061 }
 0x1c1   :  { %v656_v6 = vadd.bf16 1065369472, %v1062_v5 }
 0x1c8   :  { %v1064_v34 = vpop.eup %1063 }
 0x1c9   :  { %v1066_v7 = vpop.eup %1065  ;;  %v658_v8 = vadd.bf16 1065369472, %v1064_v34 }
 0x1ca   :  { %v1068_v9 = vpop.eup %1067  ;;  %v655_v10 = vadd.bf16 1065369472, %v1066_v7 }
 0x1cb   :  { %v657_v62 = vadd.bf16 1065369472, %v1068_v9  ;;  %1069 = vrcp.bf16 %v658_v8 }
 0x1cc   :  { %1071 = vrcp.bf16 %v656_v6 }
 0x1cd   :  { %1073 = vrcp.bf16 %v657_v62 }
 0x1ce   :  { %1075 = vrcp.bf16 %v655_v10 }
 0x1d9   :  { %v1070_v11 = vpop.eup %1069 }
 0x1da   :  { %v1072_v12 = vpop.eup %1071  ;;  %v666_v13 = vmul.bf16 1065369472, %v1070_v11 }
 0x1db   :  { %v1074_v14 = vpop.eup %1073  ;;  %v662_v18 = vmul.bf16 1065369472, %v1072_v12 }
 0x1dc   :  { %v670_v15 = vmul.bf16 %v666_v13, %v638_v0  ;;  %v664_v16 = vmul.bf16 1065369472, %v1074_v14  ;;  %v1076_v19 = vpop.eup %1075 }
 0x1dd   :  { %v668_v24 = vmul.bf16 %v662_v18, %v636_v51  ;;  %v660_v25 = vmul.bf16 1065369472, %v1076_v19  ;;  %v866_v19 = vpop.permute.xlu0 %865 }
 0x1de   :  { %997 = vmatprep.subr.bf16.mxu1 %v670_v15  ;;  %v669_v17 = vmul.bf16 %v664_v16, %v637_v42  ;;  %v868_v16 = vlaneseq }
 0x1df   :  { %998 = vmatpush3.bf16.msra.mxu1 %v670_v15  ;;  %v667_v27 = vmul.bf16 %v660_v25, %v635_v58  ;;  %v861_v15 = vld [vmem:[%s1350_s7] sm:$0x1] }
 0x1e0   :  { %999 = vmatprep.subr.bf16.mxu1 %v669_v17 }
 0x1e3   :  { %1000 = vmatpush3.bf16.msra.mxu1 %v669_v17  ;;  %v869_v17 = vshrl.u32 %v868_v16, 7 }
 0x1e4   :  { %1001 = vmatprep.subr.bf16.mxu1 %v668_v24 }
 0x1e5   :  { %v870_v18 = vsub.s32 0, %v869_v17 }
 0x1e7   :  { %1002 = vmatpush3.bf16.msra.mxu1 %v668_v24  ;;  %v871_v24 = vrot.slane %v866_v19, %v870_v18 }
 0x1e8   :  { %1003 = vmatprep.subr.bf16.mxu1 %v667_v27 }
 0x1eb   :  { %1004 = vmatpush3.bf16.msra.mxu1 %v667_v27 }
 0x1ee   :  { %1006 = vmatmul.mubr.msk.bf16.vlgmr.msra.gmra.mxu1 %vm747_vm3, %v1050_v28 }
 0x1ef   :  { %1009 = vmatprep.mubr.msk.bf16.mxu1 %vm747_vm3, %v1051_v29 }
 0x1f6   :  { %1010 = vmatmul.mubr.msk.bf16.gmra.mxu1 %vm747_vm3, %v1052_v30 }
 0x2ae   :  { %v1007_v26 = vpop.f32.mrf.mxu1 }
 0x2af   :  { %v803_v44 = vadd.f32 %v1007_v26, %v700_v39 }
 0x2b0   :  { %v794_v37 = vpop.f32.mrf.mxu1 }
 0x2b1   :  { %v795_v49 = vadd.f32 %v794_v37, %v690_v48 }
 0x2b2   :  { %v1008_v38 = vpop.f32.mrf.mxu1 }
 0x2b3   :  { %v806_v41 = vadd.f32 %v1008_v38, %v705_v20 }
 0x2b4   :  { %v797_v43 = vpop.f32.mrf.mxu1 }
 0x2b5   :  { %v826_v45 = vpack.c.bf16 %v806_v41, %v803_v44  ;;  %v798_v40 = vadd.f32 %v797_v43, %v695_v23 }
 0x2b6   :  { %v1011_v22 = vpop.f32.mrf.mxu1 }
 0x2b7   :  { %v819_v50 = vadd.f32 %v1011_v22, %v720_v33  ;;  %v959_v52 = vmul.bf16 3216621497, %v826_v45  ;;  %v825_v55 = vpack.c.bf16 %v798_v40, %v795_v49 }
 0x2b8   :  { %v810_v46 = vpop.f32.mrf.mxu1 }
 0x2b9   :  { %v811_v56 = vadd.f32 %v810_v46, %v710_v36  ;;  %1077 = vpow.bf16 %v959_v52  ;;  %v958_v59 = vmul.bf16 3216621497, %v825_v55 }
 0x2ba   :  { %v1012_v47 = vpop.f32.mrf.mxu1 }
 0x2bb   :  { %v822_v51 = vadd.f32 %v1012_v47, %v725_v32 }
 0x2bc   :  { %v813_v54 = vpop.f32.mrf.mxu1 }
 0x2bd   :  { %v828_v53 = vpack.c.bf16 %v822_v51, %v819_v50  ;;  %v814_v57 = vadd.f32 %v813_v54, %v715_v35 }
 0x2bf   :  { %v961_v58 = vmul.bf16 3216621497, %v828_v53  ;;  %v827_v21 = vpack.c.bf16 %v814_v57, %v811_v56 }
 0x2c1   :  { %1079 = vpow.bf16 %v961_v58  ;;  %v960_v60 = vmul.bf16 3216621497, %v827_v21 }
 0x2c3   :  { %1081 = vpow.bf16 %v960_v60 }
 0x2c4   :  { %1083 = vpow.bf16 %v958_v59 }
 0x2c7   :  { %v1078_v61 = vpop.eup %1077 }
 0x2c8   :  { %v846_v2 = vadd.bf16 1065369472, %v1078_v61 }
 0x2cf   :  { %v1080_v63 = vpop.eup %1079 }
 0x2d0   :  { %v848_v0 = vadd.bf16 1065369472, %v1080_v63 }
 0x2d1   :  { %v1082_v1 = vpop.eup %1081 }
 0x2d2   :  { %1085 = vrcp.bf16 %v848_v0  ;;  %v847_v3 = vadd.bf16 1065369472, %v1082_v1  ;;  %v1084_v42 = vpop.eup %1083 }
 0x2d3   :  { %v845_v4 = vadd.bf16 1065369472, %v1084_v42 }
 0x2d4   :  { %1087 = vrcp.bf16 %v847_v3 }
 0x2d5   :  { %1089 = vrcp.bf16 %v846_v2 }
 0x2d6   :  { %1091 = vrcp.bf16 %v845_v4 }
 0x2e0   :  { %v1086_v5 = vpop.eup %1085 }
 0x2e1   :  { %v856_v34 = vmul.bf16 1065369472, %v1086_v5 }
 0x2e2   :  { %v1088_v6 = vpop.eup %1087 }
 0x2e3   :  { %v860_v7 = vmul.bf16 %v856_v34, %v828_v53  ;;  %v854_v8 = vmul.bf16 1065369472, %v1088_v6  ;;  %v1090_v9 = vpop.eup %1089 }
 0x2e4   :  { %v852_v62 = vmul.bf16 1065369472, %v1090_v9  ;;  %v1092_v11 = vpop.eup %1091 }
 0x2e5   :  { %1014 = vmatpush3.bf16.msra.mxu0 %v860_v7  ;;  %v859_v10 = vmul.bf16 %v854_v8, %v827_v21  ;;  %v850_v13 = vmul.bf16 1065369472, %v1092_v11 }
 0x2e6   :  { %1015 = vmatprep.subr.bf16.mxu0 %v1100_v31  ;;  %v858_v12 = vmul.bf16 %v852_v62, %v826_v45 }
 0x2e7   :  { %v857_v14 = vmul.bf16 %v850_v13, %v825_v55 }
 0x2e9   :  { %1016 = vmatpush3.bf16.msra.mxu0 %v859_v10 }
 0x2ea   :  { %1017 = vmatprep.subr.bf16.mxu0 %v1100_v31 }
 0x2ed   :  { %1018 = vmatpush3.bf16.msra.mxu0 %v858_v12 }
 0x2ee   :  { %1019 = vmatprep.subr.bf16.mxu0 %v1100_v31 }
 0x2f1   :  { %1020 = vmatpush3.bf16.msra.mxu0 %v857_v14 }
 0x2f4   :  { %1022 = vmatmul.mubr.msk.bf16.vlgmr.msra.gmra.mxu0 %vm747_vm3, %v861_v15 }
 0x3b4   :  { %v909_v25 = vpop.f32.mrf.mxu0 }
 0x3b5   :  { %v910_v27 = vadd.f32 %v909_v25, %v871_v24 }
 0x3b6   :  { %v1023_v28 = vpop.f32.mrf.mxu0 }
 0x3b7   :  { %915 = vst [vmem:[%s1351_s9] sm:$0x1] %v910_v27 }
 0x3b8   :  { %v912_v29 = vpop.f32.mrf.mxu0 }
 0x3ba   :  { %v1024_v30 = vpop.f32.mrf.mxu0 }

</bundles_post_ra>
